<compile_context>
chip_gen: v6e
topology: v6e:2x2x1
jax: 0.10.0
libtpu: 0.0.40
codegen_flags: <defaults>
</compile_context>

<pallas_src>
import functools

import jax
import jax.numpy as jnp
from jax.experimental import pallas as pl
from jax.experimental.pallas import tpu as pltpu


def _soft_ce_kernel(logits_ref, target_ref, partial_ref, *, n_rows):
    i = pl.program_id(0)
    row_tile = logits_ref.shape[0]

    x = logits_ref[...].astype(jnp.float32)       # (row_tile, C)
    t = target_ref[...].astype(jnp.float32)       # (row_tile, C)

    # Numerically stable per-row pieces of
    #   sum_c t_c * (-log_softmax(x)_c) = (m + lse) * sum_c t_c - sum_c t_c*x_c
    m = jnp.max(x, axis=1, keepdims=True)                          # (row_tile, 1)
    lse = jnp.log(jnp.sum(jnp.exp(x - m), axis=1, keepdims=True))  # (row_tile, 1)
    sum_t = jnp.sum(t, axis=1, keepdims=True)                      # (row_tile, 1)
    sum_tx = jnp.sum(t * x, axis=1, keepdims=True)                 # (row_tile, 1)
    row_loss = (m + lse) * sum_t - sum_tx                          # (row_tile, 1)

    # Tail mask: padded rows read unspecified data and may be garbage/NaN, but a
    # select never propagates the unselected branch, so masking the cheap
    # (row_tile, 1) per-row result is sufficient (no full-tile selects/iota).
    row_ids = jax.lax.broadcasted_iota(jnp.int32, (row_tile, 1), 0) + i * row_tile
    row_loss = jnp.where(row_ids < n_rows, row_loss, 0.0)

    tile_sum = jnp.sum(row_loss, axis=0, keepdims=True)            # (1, 1)
    # Lane-dense writeback: fill the whole (1, 8, 128) output block (full vreg,
    # unmasked stores); the wrapper reads element [i, 0, 0].
    partial_ref[...] = jnp.broadcast_to(tile_sum.reshape(1, 1, 1), partial_ref.shape)


def _round_up(x, m):
    return ((x + m - 1) // m) * m


def soft_cross_entropy(logits, target, *, row_tile=None, vmem_limit_bytes=None):
    """Pallas TPU implementation of SoftCrossEntropy.forward.

    logits, target: (N, C) arrays (f32 or bf16). Returns a scalar float32 loss.
    Feeding bf16 inputs halves HBM traffic (this kernel is HBM-bound); all
    in-kernel math is done in f32 regardless of input dtype.
    """
    assert logits.shape == target.shape
    N, C = logits.shape
    if N == 0:
        # Matches torch: sum(empty) / 0 -> NaN.
        return jnp.float32(jnp.nan)

    # --- VMEM-aware tile sizing -------------------------------------------
    if vmem_limit_bytes is None:
        try:
            phys = int(pltpu.get_tpu_info().vmem_capacity_bytes)
        except Exception:
            phys = 64 * 1024 * 1024            # conservative (v7x per-TC VMEM)
        vmem_limit_bytes = min(phys * 3 // 4, 96 * 1024 * 1024)

    in_bytes = jnp.dtype(logits.dtype).itemsize + jnp.dtype(target.dtype).itemsize
    # Per-row cost: double-buffered input tiles + ~5 f32 working copies
    # (conservative; the reformulated math needs ~3-4).
    per_row = C * (2 * in_bytes + 5 * 4)
    budget = int(vmem_limit_bytes * 0.7)

    if row_tile is None:
        row_tile = max(8, (budget // per_row) // 8 * 8)
        # Raised cap (was 1024): keep tiles in the multi-MiB roofline regime
        # while bounding per-step temp pressure / compile time.
        row_tile = min(row_tile, 16384)
    row_tile = max(8, _round_up(row_tile, 8))
    row_tile = min(row_tile, _round_up(N, 8))

    grid = pl.cdiv(N, row_tile)

    # Deep input pipelining only for the forced-small-tile regime (huge C, many
    # tiny steps), and only if a third buffer still fits the VMEM budget.
    buffers = 2
    if row_tile <= 64 and grid >= 16:
        if row_tile * C * (3 * in_bytes + 5 * 4) <= budget:
            buffers = 3

    def _in_spec():
        if buffers > 2:
            return pl.BlockSpec((row_tile, C), lambda i: (i, 0),
                                pipeline_mode=pl.Buffered(buffers))
        return pl.BlockSpec((row_tile, C), lambda i: (i, 0))

    kernel = functools.partial(_soft_ce_kernel, n_rows=N)

    partials = pl.pallas_call(
        kernel,
        out_shape=jax.ShapeDtypeStruct((grid, 8, 128), jnp.float32),
        grid_spec=pltpu.PrefetchScalarGridSpec(
            num_scalar_prefetch=0,
            grid=(grid,),
            in_specs=[_in_spec(), _in_spec()],
            out_specs=pl.BlockSpec((1, 8, 128), lambda i: (i, 0, 0)),
        ),
        compiler_params=pltpu.CompilerParams(
            # No cross-step carry: each step owns its output block, so the row
            # axis can shard across both TensorCores on v7x (neutral on 1-TC
            # v5e/v6e).
            dimension_semantics=("parallel",),
            vmem_limit_bytes=vmem_limit_bytes,
        ),
    )(logits, target)

    # Tiny cross-tile reduce + normalize in JAX.
    return jnp.sum(partials[:, 0, 0]) / jnp.float32(N)


def _reference(logits, target):
    log_sm = jax.nn.log_softmax(logits.astype(jnp.float32), axis=1)
    return jnp.sum(-log_sm * target.astype(jnp.float32)) / target.shape[0]


if __name__ == "__main__":
    key = jax.random.PRNGKey(0)
    k1, k2 = jax.random.split(key)

    # N deliberately NOT a multiple of the tile to exercise tail masking, and
    # an explicit small row_tile to exercise the multi-step (parallel) grid.
    N, C = 52, 128
    logits = jax.random.normal(k1, (N, C), dtype=jnp.float32)
    # Soft target distribution per row, as typical for soft CE.
    target = jax.nn.softmax(jax.random.normal(k2, (N, C), dtype=jnp.float32), axis=1)

    loss = soft_cross_entropy(logits, target, row_tile=16)
    loss = jax.block_until_ready(loss)
    ref = _reference(logits, target)
    assert jnp.allclose(loss, ref, rtol=1e-4, atol=1e-5), (loss, ref)

    # bf16 inputs (recommended in production: halves HBM traffic; math stays f32),
    # auto (VMEM-derived) row_tile path.
    logits_bf16 = logits.astype(jnp.bfloat16)
    target_bf16 = target.astype(jnp.bfloat16)
    loss_bf16 = soft_cross_entropy(logits_bf16, target_bf16)
    loss_bf16 = jax.block_until_ready(loss_bf16)
    ref_bf16 = _reference(logits_bf16, target_bf16)
    assert jnp.allclose(loss_bf16, ref_bf16, rtol=5e-3, atol=5e-3), (loss_bf16, ref_bf16)

    print("KERNEL_OK")
</pallas_src>

<mosaic_0001>
module attributes {stable_mosaic.version = 11 : i64} {
  func.func @_soft_ce_kernel(%arg0: i32, %arg1: memref<16x128xf32, #tpu.memory_space<vmem>>, %arg2: memref<16x128xf32, #tpu.memory_space<vmem>>, %arg3: memref<1x8x128xf32, #tpu.memory_space<vmem>>) attributes {dimension_semantics = [#tpu.dimension_semantics<parallel>], iteration_bounds = array<i64: 4>, scalar_prefetch = 0 : i64, scratch_operands = 0 : i64, tpu.core_type = #tpu.core_type<tc>, window_params = [{transform_indices = @transform_0, window_bounds = array<i64: 16, 128>}, {transform_indices = @transform_1, window_bounds = array<i64: 16, 128>}, {transform_indices = @transform_2, window_bounds = array<i64: 1, 8, 128>}]} {
    %c0 = arith.constant 0 : index
    %c0_0 = arith.constant 0 : index
    %0 = vector.load %arg1[%c0, %c0_0] : memref<16x128xf32, #tpu.memory_space<vmem>>, vector<16x128xf32>
    %c0_1 = arith.constant 0 : index
    %c0_2 = arith.constant 0 : index
    %1 = vector.load %arg2[%c0_1, %c0_2] : memref<16x128xf32, #tpu.memory_space<vmem>>, vector<16x128xf32>
    %cst = arith.constant dense<0xFF800000> : vector<16xf32>
    %2 = vector.multi_reduction <maximumf>, %0, %cst [1] : vector<16x128xf32> to vector<16xf32>
    %3 = vector.shape_cast %2 : vector<16xf32> to vector<16x1xf32>
    %4 = vector.broadcast %3 : vector<16x1xf32> to vector<16x128xf32>
    %5 = arith.subf %0, %4 : vector<16x128xf32>
    %6 = math.exp %5 : vector<16x128xf32>
    %cst_3 = arith.constant dense<0.000000e+00> : vector<16xf32>
    %7 = vector.multi_reduction <add>, %6, %cst_3 [1] : vector<16x128xf32> to vector<16xf32>
    %8 = vector.shape_cast %7 : vector<16xf32> to vector<16x1xf32>
    %9 = math.log %8 : vector<16x1xf32>
    %cst_4 = arith.constant dense<0.000000e+00> : vector<16xf32>
    %10 = vector.multi_reduction <add>, %1, %cst_4 [1] : vector<16x128xf32> to vector<16xf32>
    %11 = vector.shape_cast %10 : vector<16xf32> to vector<16x1xf32>
    %12 = arith.mulf %1, %0 : vector<16x128xf32>
    %cst_5 = arith.constant dense<0.000000e+00> : vector<16xf32>
    %13 = vector.multi_reduction <add>, %12, %cst_5 [1] : vector<16x128xf32> to vector<16xf32>
    %14 = vector.shape_cast %13 : vector<16xf32> to vector<16x1xf32>
    %15 = arith.addf %3, %9 : vector<16x1xf32>
    %16 = arith.mulf %15, %11 : vector<16x1xf32>
    %17 = arith.subf %16, %14 : vector<16x1xf32>
    %18 = tpu.iota {dimensions = array<i32: 0>} : vector<16x1xi32>
    %c16_i32 = arith.constant 16 : i32
    %19 = arith.muli %arg0, %c16_i32 : i32
    %20 = vector.broadcast %19 : i32 to vector<16x1xi32>
    %21 = arith.addi %18, %20 : vector<16x1xi32>
    %c52_i32 = arith.constant 52 : i32
    %22 = vector.broadcast %c52_i32 : i32 to vector<16x1xi32>
    %23 = arith.cmpi slt, %21, %22 : vector<16x1xi32>
    %cst_6 = arith.constant 0.000000e+00 : f32
    %24 = vector.broadcast %cst_6 : f32 to vector<16x1xf32>
    %25 = arith.select %23, %17, %24 : vector<16x1xi1>, vector<16x1xf32>
    %cst_7 = arith.constant dense<0.000000e+00> : vector<1xf32>
    %26 = vector.multi_reduction <add>, %25, %cst_7 [0] : vector<16x1xf32> to vector<1xf32>
    %27 = vector.shape_cast %26 : vector<1xf32> to vector<1x1xf32>
    %28 = vector.shape_cast %27 : vector<1x1xf32> to vector<1x1x1xf32>
    %29 = vector.shape_cast %28 : vector<1x1x1xf32> to vector<1x1x1xf32>
    %30 = vector.broadcast %29 : vector<1x1x1xf32> to vector<1x8x128xf32>
    %c0_8 = arith.constant 0 : index
    %c0_9 = arith.constant 0 : index
    %c0_10 = arith.constant 0 : index
    %31 = vector.load %arg3[%c0_8, %c0_9, %c0_10] : memref<1x8x128xf32, #tpu.memory_space<vmem>>, vector<1x8x128xf32>
    tpu.vector_store %arg3[%c0_8, %c0_9, %c0_10], %30 {strides = array<i32>} : memref<1x8x128xf32, #tpu.memory_space<vmem>>, vector<1x8x128xf32>,
    return
  }
  func.func @transform_0(%arg0: i32) -> (i32, i32) {
    %c0_i32 = arith.constant 0 : i32
    %c0_i32_0 = arith.constant 0 : i32
    return %arg0, %c0_i32 : i32, i32
  }
  func.func @transform_1(%arg0: i32) -> (i32, i32) {
    %c0_i32 = arith.constant 0 : i32
    %c0_i32_0 = arith.constant 0 : i32
    return %arg0, %c0_i32 : i32, i32
  }
  func.func @transform_2(%arg0: i32) -> (i32, i32, i32) {
    %c0_i32 = arith.constant 0 : i32
    %c0_i32_0 = arith.constant 0 : i32
    %c0_i32_1 = arith.constant 0 : i32
    return %arg0, %c0_i32, %c0_i32_0 : i32, i32, i32
  }
}

</mosaic_0001>

<bundles_post_ra>
// kernel: tpu_custom_call.1
= control target key start
LH: loop header
LB: loop body
LE: loop exit
PB: predicated region body
PF: predicated region fallthrough
CT: control target
= control target key end

     0   :  { %7 = vsyncpa [#allocation3], 0  ;;  %s808_s0 = inlined_call_operand.hbm [shape: f32[52,128], index: 0, kind: input, shape index: {}]   ;;  %s809_s1 = inlined_call_operand.hbm [shape: f32[52,128], index: 1, kind: input, shape index: {}]   ;;  %s810_s2 = inlined_call_operand.hbm [shape: f32[4,8,128], index: 2, kind: output, shape index: {}]  }
   0x1   :  { %9 = vsyncpa [#allocation3 + $0x1], 0 }
   0x2   :  { %10 = vsyncpa [#allocation6], 0 }
   0x3   :  { %12 = vsyncpa [#allocation6 + $0x1], 0 }
   0x4   :  { %13 = vsyncpa [#allocation4], 0 }
   0x5   :  { %15 = vsyncpa [#allocation4 + $0x1], 0  ;;  %s613_s9 = smov 0   ;;  %s615_s10 = smov 0  }
   0x6   :  { %s617_s11 = smov 0   ;;  %s619_s12 = smov 0  }
   0x7 LB: > { %s634_s13 = sadd.s32 4294967295, %s589_s12   ;;  %s388_s14 = sadd.s32 4294967294, %s589_s12   ;;  %s589_s12 = sphi %s619_s12, %s821_s12   ;;  %s585_s11 = sphi %s617_s11, %s820_s11   ;;  %s581_s10 = sphi %s615_s10, %s819_s10   ;;  %s577_s9 = sphi %s613_s9, %s818_s9  }
   0x8   : > { %s638_s15 = sadd.s32 1, %s589_s12   ;;  %s28_s16 = sadd.s32 1, %s585_s11 }
   0x9   : > { %s25_s17 = ssub.s32 %s589_s12, %s638_s15  ;;  %p35_p0 = scmp.ne.s32.totalorder %s585_s11, %s581_s10 }
   0xa   : > { %p26_p1 = scmp.eq.s32.totalorder %s25_s17, 0  ;;  %p36_p2 = scmp.eq.s32.totalorder %s589_s12, 0 }
   0xb   : > { %p41_p3 = scmp.ne.s32.totalorder %s581_s10, %s577_s9  ;;  %p42_p4 = scmp.eq.s32.totalorder %s634_s13, 0 }
   0xc   : > { %s650_s18 = scalar_select %p26_p1, %s585_s11, %s28_s16  }
   0xd   : > { %p652_p5 = por %p36_p2, %p35_p0  ;;  %p656_p6 = por %p42_p4, %p41_p3 }
   0xe   : > { %p91_p7 = scmp.eq.s32.totalorder %s634_s13, 3  ;;  %p97_p8 = scmp.eq.s32.totalorder %s388_s14, 3 }
   0xf   : > { %p390_p11 = scmp.ge.s32.totalorder %s589_s12, 4 }
  0x10   : > { %p661_p9 = por %p91_p7, %p35_p0  ;;  %p665_p10 = por %p97_p8, %p41_p3 }
  0x11   : > { %113 = sbr.rel (%p390_p11) target bundleno = 86 (0x56), region = 16 }
  0x12   : > { %s814_s21 = scalar_select %p661_p9, 1, 0 }
  0x13   : > { %s815_s22 = scalar_select %p665_p10, 1, 0 }
  0x16   : > { %116 = sbr.rel (!%p652_p5) target bundleno = 54 (0x36), region = 20  ;;  %s117_s23 = sand.u32 (%p652_p5), 1, %s585_s11  }
  0x17   : > { %s392_s24 = sshll.u32 (%p652_p5), %s589_s12, 1  ;;  %s391_s25 = sshll.u32 (%p652_p5), %s117_s23, 4 }
  0x18   : > { %s123_s26 = ssub.s32 (%p652_p5), 7, %s392_s24  ;;  %s677_s29 = scalar_lea.sflag (%p652_p5), [#allocation3], %s117_s23 }
  0x19   : > { %p124_p12 = scmp.lt.s32.totalorder (%p652_p5), %s123_s26, 2  ;;  %s121_s30 = scalar_lea.vmem (%p652_p5), [#allocation2], %s391_s25 }
  0x1b   : > { %s823_s26 = smov (!%p124_p12, %s123_s26), 2 }
  0x1c   : > { %s674_s27 = sshll.u32 %s823_s26, 7 }
  0x1d   : > { %s128_s28 = ssub.s32 256, %s674_s27 }
  0x1e   : > { %129 = vsyncadd %s677_s29, %s128_s28  ;;  %p394_p13 = scmp.ne.s32.totalorder %s674_s27, 0  ;;  %s414_s3 = sshll.u32 %s589_s12, 8 }
  0x1f   : > { %s685_s6 = scalar_lea.hbm %s808_s0, %s414_s3  ;;  %s134_s7 = sshll.u32 %s121_s30, 4  ;;  %s687_s7 = int_to_ptr.vmem [resolvable:$true] %s134_s7 }
  0x20   : > { %s469_s8 = scalar_lea.hbm %s685_s6, %s674_s27  ;;  %s473_s17 = scalar_lea.hbm %s808_s0, 896 }
  0x21   : > { %p470_p0 = scmp.ne.s32.totalorder %s685_s6, %s469_s8  ;;  %p474_p3 = scmp.lt.s32.totalorder %s685_s6, %s808_s0 }
  0x22   : > { %p475_p4 = scmp.lt.s32.totalorder %s473_s17, %s469_s8 }
  0x23   : > { %p471_p1 = pnand %p470_p0, %p394_p13 }
  0x24   : > { %p476_p7 = por %p475_p4, %p474_p3 }
  0x25   : > { %p472_p2 = pneg %p471_p1 }
  0x27   : > { %p477_p8 = pnand %p476_p7, %p472_p2 }
  0x29   : > { %480 = shalt.err (!%p477_p8)
}
  0x2a   : > { %s481_s25 = scalar_lea.vmem %s687_s7, %s674_s27  ;;  %s591_s26 = smov [#allocation2]  }
  0x2b   : > { %p482_p11 = scmp.ne.s32.totalorder %s687_s7, %s481_s25  ;;  %s485_s28 = sshll.u32 %s591_s26, 4  ;;  %s486_s28 = int_to_ptr.vmem [resolvable:$false] %s485_s28 }
  0x2c   : > { %s487_s30 = scalar_lea.vmem %s486_s28, 512  ;;  %p488_p1 = scmp.lt.s32.totalorder %s687_s7, %s486_s28 }
  0x2d   : > { %p483_p12 = pnand %p482_p11, %p394_p13  ;;  %p489_p10 = scmp.lt.s32.totalorder %s487_s30, %s481_s25 }
  0x2f   : > { %p484_p0 = pneg %p483_p12  ;;  %p490_p9 = por %p489_p10, %p488_p1 }
  0x31   : > { %p491_p3 = pnand %p490_p9, %p484_p0 }
  0x33   : > { %494 = shalt.err (!%p491_p3)
}
  0x34   : > { %s592_s3 = smov 128   ;;  %s593_s4 = smov 8  }
  0x35   : > { %140 = dma.hbm_to_vmem [thread:$0]  (%p394_p13), %s685_s6, %s674_s27, %s687_s7, %s677_s29, %s592_s3, %s592_s3, %s593_s4  }
  0x36 PF: > { %143 = sbr.rel (!%p652_p5) target bundleno = 86 (0x56), region = 24  ;;  %s144_s5 = sand.u32 (%p652_p5), 1, %s585_s11  }
  0x37   : > { %s399_s8 = sshll.u32 (%p652_p5), %s589_s12, 1  ;;  %s398_s14 = sshll.u32 (%p652_p5), %s144_s5, 4 }
  0x38   : > { %s150_s16 = ssub.s32 (%p652_p5), 7, %s399_s8  ;;  %s720_s24 = scalar_lea.sflag (%p652_p5), [#allocation6], %s144_s5 }
  0x39   : > { %p151_p9 = scmp.lt.s32.totalorder (%p652_p5), %s150_s16, 2  ;;  %s148_s27 = scalar_lea.vmem (%p652_p5), [#allocation5], %s398_s14 }
  0x3b   : > { %s825_s16 = smov (!%p151_p9, %s150_s16), 2 }
  0x3c   : > { %s717_s17 = sshll.u32 %s825_s16, 7 }
  0x3d   : > { %s155_s23 = ssub.s32 256, %s717_s17 }
  0x3e   : > { %156 = vsyncadd %s720_s24, %s155_s23  ;;  %p401_p5 = scmp.ne.s32.totalorder %s717_s17, 0  ;;  %s415_s19 = sshll.u32 %s589_s12, 8 }
  0x3f   : > { %s728_s7 = scalar_lea.hbm %s809_s1, %s415_s19  ;;  %s161_s25 = sshll.u32 %s148_s27, 4  ;;  %s730_s25 = int_to_ptr.vmem [resolvable:$true] %s161_s25 }
  0x40   : > { %s495_s26 = scalar_lea.hbm %s728_s7, %s717_s17  ;;  %s499_s3 = scalar_lea.hbm %s809_s1, 896 }
  0x41   : > { %p496_p10 = scmp.ne.s32.totalorder %s728_s7, %s495_s26  ;;  %p500_p4 = scmp.lt.s32.totalorder %s728_s7, %s809_s1 }
  0x42   : > { %p501_p7 = scmp.lt.s32.totalorder %s499_s3, %s495_s26 }
  0x43   : > { %p497_p13 = pnand %p496_p10, %p401_p5 }
  0x44   : > { %p502_p8 = por %p501_p7, %p500_p4 }
  0x45   : > { %p498_p2 = pneg %p497_p13 }
  0x47   : > { %p503_p11 = pnand %p502_p8, %p498_p2 }
  0x49   : > { %506 = shalt.err (!%p503_p11)
}
  0x4a   : > { %s507_s8 = scalar_lea.vmem %s730_s25, %s717_s17  ;;  %s594_s14 = smov [#allocation5]  }
  0x4b   : > { %p508_p12 = scmp.ne.s32.totalorder %s730_s25, %s507_s8  ;;  %s511_s16 = sshll.u32 %s594_s14, 4  ;;  %s512_s16 = int_to_ptr.vmem [resolvable:$false] %s511_s16 }
  0x4c   : > { %s513_s23 = scalar_lea.vmem %s512_s16, 512  ;;  %p514_p3 = scmp.lt.s32.totalorder %s730_s25, %s512_s16 }
  0x4d   : > { %p509_p0 = pnand %p508_p12, %p401_p5  ;;  %p515_p9 = scmp.lt.s32.totalorder %s513_s23, %s507_s8 }
  0x4f   : > { %p510_p1 = pneg %p509_p0  ;;  %p516_p10 = por %p515_p9, %p514_p3 }
  0x51   : > { %p517_p13 = pnand %p516_p10, %p510_p1 }
  0x53   : > { %520 = shalt.err (!%p517_p13)
}
  0x54   : > { %s595_s27 = smov 128   ;;  %s596_s19 = smov 8  }
  0x55   : > { %167 = dma.hbm_to_vmem [thread:$0]  (%p401_p5), %s728_s7, %s717_s17, %s730_s25, %s720_s24, %s595_s27, %s595_s27, %s596_s19  }
  0x56 PF: > { %p405_p2 = scmp.ge.s32.totalorder %s589_s12, 1  ;;  %p169_p4 = scmp.lt.s32.totalorder %s589_s12, 5 }
  0x58   : > { %p170_p7 = pnand %p405_p2, %p169_p4 }
  0x59   : > { %s759_s29 = sand.u32 (!%p170_p7), 1, %s581_s10  }
  0x5a   : > { %173 = sbr.rel (%p170_p7) target bundleno = 447 (0x1bf), region = 28  ;;  %s406_s6 = sshll.u32 (!%p170_p7), %s759_s29, 4 }
  0x5b   : > { %s176_s26 = scalar_lea.sflag (!%p170_p7), [#allocation3], %s759_s29  ;;  %s179_s28 = scalar_lea.vmem (!%p170_p7), [#allocation2], %s406_s6 }
  0x5f   : > { %564 = dma.done.wait (%p656_p6), %s176_s26, 256  }
  0x60   : > { %566 = vsyncadd (%p656_p6), %s176_s26, 4294967040  ;;  %s185_s17 = scalar_lea.sflag [#allocation6], %s759_s29  ;;  %s188_s24 = scalar_lea.vmem [#allocation5], %s406_s6 }
  0x61   : > { %568 = dma.done.wait (%p656_p6), %s185_s17, 256  }
  0x62   : > { %570 = vsyncadd (%p656_p6), %s185_s17, 4294967040  ;;  %v224_v0 = vld [vmem:[%s179_s28] sm:$0xff]  ;;  %v225_v1 = vld [vmem:[%s179_s28 + $0x8] sm:$0xff]  ;;  %v262_v16 = vlaneseq  ;;  %s409_s20 = sshll.u32 %s634_s13, 4  ;;  %s408_s7 = sshll.u32 %s759_s29, 3 }
  0x63   : > { %228 = vmax.xlane.f32.xlu0 %v224_v0  ;;  %v226_v2 = vld [vmem:[%s188_s24] sm:$0xff]  ;;  %v227_v12 = vld [vmem:[%s188_s24 + $0x8] sm:$0xff]  ;;  %v266_v24 = vstv %s409_s20  ;;  %s411_s25 = sshll.u32 %s634_s13, 7  ;;  %s213_s30 = scalar_lea.vmem [#allocation7], %s408_s7 }
  0x64   : > { %v250_v3 = vmul.f32 %v226_v2, %v224_v0  ;;  %v251_v13 = vmul.f32 %v227_v12, %v225_v1  ;;  %v263_v19 = vshrl.u32 %v262_v16, 7  ;;  %s295_s3 = sshll.u32 %s213_s30, 4  ;;  %s293_s8 = scalar_lea.hbm %s810_s2, %s411_s25  ;;  %s296_s3 = int_to_ptr.vmem [resolvable:$true] %s295_s3 }
  0x65   : > { %s282_s14 = scalar_lea.sflag [#allocation4], %s759_s29  ;;  %s521_s16 = scalar_lea.vmem %s296_s3, 128 }
  0x66   : > { %v264_v22 = vadd.s32 8, %v263_v19  ;;  %v267_v28 = vadd.s32 %v266_v24, %v263_v19  ;;  %p522_p6 = scmp.ne.s32.totalorder %s296_s3, %s521_s16  ;;  %p816_p5 = scmp.ne.s32.totalorder %s814_s21, 0 }
  0x67   : > { %230 = vmax.xlane.f32.xlu0 %v225_v1  ;;  %s597_s23 = smov [#allocation7]  }
  0x68   : > { %v268_v30 = vadd.s32 %v266_v24, %v264_v22  ;;  %vm269_vm0 = vcmp.lt.s32.totalorder %v267_v28, 52  ;;  %p523_p8 = pnand %p522_p6, %p816_p5  ;;  %s525_s27 = sshll.u32 %s597_s23, 4  ;;  %s526_s27 = int_to_ptr.vmem [resolvable:$false] %s525_s27 }
  0x69   : > { %s527_s13 = scalar_lea.vmem %s526_s27, 256  ;;  %p528_p12 = scmp.lt.s32.totalorder %s296_s3, %s526_s27 }
  0x6a   : > { %vm270_vm1 = vcmp.lt.s32.totalorder %v268_v30, 52  ;;  %p524_p11 = pneg %p523_p8  ;;  %p529_p0 = scmp.lt.s32.totalorder %s527_s13, %s521_s16 }
  0x6b   : > { %246 = vadd.xlane.f32.xlu0 %v226_v2 }
  0x6c   : > { %p530_p1 = por %p529_p0, %p528_p12 }
  0x6e   : > { %p531_p3 = pnand %p530_p1, %p524_p11 }
  0x6f   : > { %252 = vadd.xlane.f32.xlu0 %v250_v3 }
  0xec   : > { %v229_v4 = vpop.xlane.xlu0 %228 }
  0xed   : > { %v232_v5 = vsub.f32 %v224_v0, %v229_v4 }
  0xef   : > { %v234_v6 = vmul.f32 1.442695, %v232_v5 }
  0xf0   : > { %v231_v7 = vpop.xlane.xlu0 %230 }
  0xf1   : > { %461 = vpow2.f32 %v234_v6  ;;  %v233_v8 = vsub.f32 %v225_v1, %v231_v7 }
  0xf3   : > { %v236_v9 = vmul.f32 1.442695, %v233_v8 }
  0xf4   : > { %v247_v18 = vpop.xlane.xlu0 %246 }
  0xf5   : > { %463 = vpow2.f32 %v236_v9 }
  0xf8   : > { %v253_v29 = vpop.xlane.xlu0 %252 }
  0xfe   : > { %v462_v10 = vpop.eup %461 }
  0xff   : > { %238 = vadd.xlane.f32.xlu1 %v462_v10 }
 0x102   : > { %v464_v11 = vpop.eup %463 }
 0x103   : > { %240 = vadd.xlane.f32.xlu1 %v464_v11 }
 0x107   : > { %248 = vadd.xlane.f32.xlu1 %v227_v12 }
 0x10b   : > { %254 = vadd.xlane.f32.xlu1 %v251_v13 }
 0x188   : > { %v239_v14 = vpop.xlane.xlu1 %238 }
 0x189   : > { %465 = vlog2.f32 %v239_v14 }
 0x18c   : > { %v241_v15 = vpop.xlane.xlu1 %240 }
 0x18d   : > { %467 = vlog2.f32 %v241_v15 }
 0x190   : > { %v249_v21 = vpop.xlane.xlu1 %248 }
 0x194   : > { %v255_v32 = vpop.xlane.xlu1 %254 }
 0x196   : > { %v466_v17 = vpop.eup %465 }
 0x197   : > { %v243_v20 = vmul.f32 0.6931472, %v466_v17 }
 0x199   : > { %v256_v23 = vadd.f32 %v243_v20, %v229_v4 }
 0x19a   : > { %v468_v25 = vpop.eup %467 }
 0x19b   : > { %v245_v26 = vmul.f32 0.6931472, %v468_v25  ;;  %v258_v27 = vmul.f32 %v256_v23, %v247_v18 }
 0x19d   : > { %v257_v31 = vadd.f32 %v245_v26, %v231_v7  ;;  %v260_v34 = vsub.f32 %v258_v27, %v253_v29 }
 0x19f   : > { %v259_v33 = vmul.f32 %v257_v31, %v249_v21  ;;  %v271_v36 = vsel %vm269_vm0, %v260_v34, 0.0 }
 0x1a1   : > { %v261_v35 = vsub.f32 %v259_v33, %v255_v32 }
 0x1a3   : > { %v272_v37 = vsel %vm270_vm1, %v261_v35, 0.0 }
 0x1a4   : > { %v273_v38 = vadd.f32 %v272_v37, %v271_v36 }
 0x1a6   : > { %v274_v39 = vrot.slane %v273_v38, 4 }
 0x1a8   : > { %v275_v40 = vadd.f32 %v274_v39, %v273_v38 }
 0x1aa   : > { %v276_v41 = vrot.slane %v275_v40, 2 }
 0x1ac   : > { %v277_v42 = vadd.f32 %v276_v41, %v275_v40 }
 0x1ae   : > { %v278_v43 = vrot.slane %v277_v42, 1 }
 0x1b0   : > { %v279_v44 = vadd.f32 %v278_v43, %v277_v42 }
 0x1b2   : > { %280 = vst [vmem:[%s213_s30] sm:$0xff] %v279_v44 }
 0x1b3   : > { %534 = shalt.err (!%p531_p3)
}
 0x1b4   : > { %s535_s19 = scalar_lea.hbm %s293_s8, 128  ;;  %s539_s26 = scalar_lea.hbm %s810_s2, 512 }
 0x1b5   : > { %p536_p9 = scmp.ne.s32.totalorder %s293_s8, %s535_s19  ;;  %p540_p2 = scmp.lt.s32.totalorder %s293_s8, %s810_s2 }
 0x1b6   : > { %p541_p4 = scmp.lt.s32.totalorder %s539_s26, %s535_s19 }
 0x1b7   : > { %p537_p10 = pnand %p536_p9, %p816_p5 }
 0x1b8   : > { %p542_p7 = por %p541_p4, %p540_p2 }
 0x1b9   : > { %p538_p13 = pneg %p537_p10 }
 0x1bb   : > { %p543_p6 = pnand %p542_p7, %p538_p13 }
 0x1bd   : > { %546 = shalt.err (!%p543_p6)
}
 0x1be   : > { %418 = dma.vmem_to_hbm [thread:$0]  (%p816_p5), %s296_s3, 128, %s293_s8, %s282_s14  }
 0x1bf PF: > { %p424_p8 = scmp.ge.s32.totalorder %s589_s12, 2  ;;  %s307_s24 = sand.u32 1, %s577_s9  }
 0x1c0   : > { %p817_p11 = scmp.ne.s32.totalorder %s815_s22, 0  ;;  %s308_s20 = scalar_lea.sflag [#allocation4], %s307_s24 }
 0x1c2   : > { %p421_p12 = pnand %p424_p8, %p817_p11 }
 0x1c4   : > { %p422_p0 = pneg %p421_p12 }
 0x1c6   : > { %572 = dma.done.wait (%p422_p0), %s308_s20, 128  }
 0x1c7   : > { %574 = vsyncadd (%p422_p0), %s308_s20, 4294967168  ;;  %p18_p1 = scmp.ge.s32.totalorder %s638_s15, 6   ;;  %s818_s9 = smov %s581_s10 }
 0x1c8   : > { %s819_s10 = smov %s585_s11  ;;  %s820_s11 = smov %s650_s18 }
 0x1c9   : > { %s821_s12 = smov %s638_s15  ;;  %20 = sbr.rel (!%p18_p1) target bundleno = 7 (0x7), region = 86 }
 0x1ce   :  { %313 = vsyncpa [#allocation3], 1 }
 0x1cf   :  { %315 = vsyncpa [#allocation3 + $0x1], 1 }
 0x1d0   :  { %316 = vsyncpa [#allocation6], 1 }
 0x1d1   :  { %318 = vsyncpa [#allocation6 + $0x1], 1 }
 0x1d2   :  { %319 = vsyncpa [#allocation4], 1 }
 0x1d3   :  { %321 = vsyncpa [#allocation4 + $0x1], 1 }

</bundles_post_ra>
